<compile_context>
chip_gen: v6e
topology: v6e:2x2x1
jax: 0.10.0
libtpu: 0.0.40
codegen_flags: <defaults>
</compile_context>

<pallas_src>
import math
import functools
from typing import NamedTuple

import jax
import jax.numpy as jnp
from jax.experimental import pallas as pl
from jax.experimental.pallas import tpu as pltpu


_EPS_SQ = 1e-24  # F.normalize eps = 1e-12, squared (we work with squared norms)


# ----------------------------------------------------------------------------- kernel


def _arcface_kernel(x_ref, wt_ref, inv_wn_ref, s_inv_xn_ref, delta_ref, label_ref,
                    out_ref, *, tile_c):
    # x_ref:        (B, D)        raw activations (streaming dtype), resident
    # wt_ref:       (D, tile_c)   raw weight tile (pre-transposed, streamed)
    # inv_wn_ref:   (1, tile_c)   precomputed 1/max(||w_c||, eps), f32 (0 in pad cols)
    # s_inv_xn_ref: (B, 1)        precomputed s/max(||x_row||, eps), f32
    # delta_ref:    (B, 1)        precomputed s*(phi - cos) for the label column, f32
    # label_ref:    (B, 1)        int32 labels (-1 => no label => pure s*cosine)
    # out_ref:      (B, tile_c)   output
    j = pl.program_id(0)

    # Raw matmul on the MXU (f32 accumulation); cosine recovered by rank-1 rescale.
    dots = jnp.dot(x_ref[...], wt_ref[...], preferred_element_type=jnp.float32)

    s_cos = dots * s_inv_xn_ref[...] * inv_wn_ref[...]          # s * cosine, (B, tile_c)

    # One-hot select without a full (B, tile_c) iota: compare lane ids against the
    # tile-relative label.
    rel_label = label_ref[...] - j * tile_c                     # (B, 1) int32
    lane_ids = jax.lax.broadcasted_iota(jnp.int32, (1, tile_c), 1)
    one_hot = lane_ids == rel_label                             # (B, tile_c) bool

    out_ref[...] = (s_cos + jnp.where(one_hot, delta_ref[...], 0.0)).astype(out_ref.dtype)


# ----------------------------------------------------------------------------- sizing


def _vmem_capacity_bytes():
    try:
        return int(pltpu.get_tpu_info().vmem_capacity_bytes)
    except Exception:
        return 64 * 1024 * 1024  # conservative fallback (v7x per-core VMEM)


def _choose_tile_c(C, D, B, in_itemsize, out_itemsize, max_tile_c, tile_c=None):
    """Largest class tile (multiple of 128) whose working set fits ~half of VMEM,
    capped so the 1-D class grid has at least 2 steps (v7x has 2 TCs)."""
    c128 = ((C + 127) // 128) * 128
    vmem = _vmem_capacity_bytes()
    budget = vmem // 2
    # Actual buffer multiplicities (default double buffering):
    per_col = 2 * D * in_itemsize + 2 * B * out_itemsize + 2 * 4   # weight + out + inv_wn
    fixed = 2 * B * D * in_itemsize + 6 * B * 4 + (2 << 20)        # x, small per-row inputs, slack
    avail = max(budget - fixed, 128 * per_col)
    t = min(max_tile_c, avail // per_col)
    t = max(128, (t // 128) * 128)
    # Guarantee >= 2 grid steps so "parallel" can shard across both v7x TensorCores.
    if c128 >= 256:
        t = min(t, max(128, ((c128 // 2) // 128) * 128))
    t = min(t, c128)
    if tile_c is not None:
        # Honor a user-supplied tile, but never exceed the per-generation budget.
        t = max(128, min(((tile_c + 127) // 128) * 128, t))
    return t


def _vmem_limit_bytes(B, D, tile_c, in_itemsize, out_itemsize):
    vmem = _vmem_capacity_bytes()
    need = (2 * D * tile_c * in_itemsize        # weight tiles (double-buffered)
            + 2 * B * tile_c * out_itemsize     # output tiles
            + 2 * tile_c * 4                    # inv_wn tiles
            + 2 * B * D * in_itemsize           # resident x
            + 6 * B * 4                         # s/||x||, delta, label
            + (2 << 20))                        # Mosaic internal slack
    return int(min(vmem * 3 // 4, max(need, 32 << 20)))


# ----------------------------------------------------------------------------- params


class ArcMarginParams(NamedTuple):
    wt: jax.Array        # (D, c_pad)  streaming dtype, zero-padded classes
    inv_wn: jax.Array    # (1, c_pad)  f32, 1/||w_c|| (0 in padded columns)
    out_features: int
    tile_c: int


def prepare_arcface_params(weight, *, compute_dtype=jnp.bfloat16, out_dtype=jnp.float32,
                           batch_hint=256, tile_c=None, max_tile_c=None):
    """One-time weight preparation (do this at init, not per forward call).

    weight: (out_features, in_features) f32, PyTorch layout.
    compute_dtype: streaming dtype for x / weight (bf16 default; matmul accumulates f32).
    """
    C, D = weight.shape
    in_itemsize = jnp.dtype(compute_dtype).itemsize
    out_itemsize = jnp.dtype(out_dtype).itemsize
    if max_tile_c is None:
        # Small-D: per-step weight DMA is tiny, so use bigger class tiles.
        max_tile_c = 8192 if D <= 128 else 2048
    tile_c = _choose_tile_c(C, D, batch_hint, in_itemsize, out_itemsize, max_tile_c, tile_c)
    c_pad = pl.cdiv(C, tile_c) * tile_c

    w32 = weight.astype(jnp.float32)
    inv_wn = jax.lax.rsqrt(jnp.maximum(jnp.sum(w32 * w32, axis=1), _EPS_SQ))   # (C,)

    wt = weight.T.astype(compute_dtype)                                        # (D, C)
    if c_pad != C:
        # Keep the class padding explicitly zeroed (inv_wn pad is zero too, so padded
        # columns are exactly 0 in the kernel regardless of the weight pad contents).
        wt = jnp.pad(wt, ((0, 0), (0, c_pad - C)))
        inv_wn = jnp.pad(inv_wn, (0, c_pad - C))

    return ArcMarginParams(wt=wt, inv_wn=inv_wn.reshape(1, c_pad),
                           out_features=C, tile_c=tile_c)


# ----------------------------------------------------------------------------- forward


def _label_delta(x_stream, inv_xn, wt, inv_wn, label, s, cos_m, sin_m, th, mm, easy_margin):
    """Per-row delta = s*(phi - cos) for the label column, using the SAME streaming
    dtype / normalization convention as the kernel so out[:, label] stays consistent."""
    w_cols = jnp.take(wt, label, axis=1).T                      # (B, D), stream dtype
    raw = jnp.einsum('bd,bd->b', x_stream, w_cols,
                     preferred_element_type=jnp.float32)        # (B,)
    cos = raw * inv_xn[:, 0] * jnp.take(inv_wn[0], label)       # (B,) f32
    sine = jnp.sqrt(jnp.maximum(1.0 - cos * cos, 0.0))
    phi = cos * cos_m - sine * sin_m
    if easy_margin:
        phi = jnp.where(cos > 0.0, phi, cos)
    else:
        phi = jnp.where(cos > th, phi, cos - mm)
    return (s * (phi - cos)).reshape(-1, 1)                     # (B, 1) f32


def arc_margin_product(x, params: ArcMarginParams, label=None, *, s=30.0, m=0.5,
                       easy_margin=False, out_dtype=jnp.float32):
    """ArcFace forward. x: (B, D) f32; params from prepare_arcface_params;
    label: (B,) int or None. Returns (B, out_features) in out_dtype."""
    B, D = x.shape
    wt, inv_wn = params.wt, params.inv_wn
    D2, c_pad = wt.shape
    assert D == D2
    C = params.out_features
    tile_c = params.tile_c

    cos_m = math.cos(m)
    sin_m = math.sin(m)
    th = math.cos(math.pi - m)
    mm = math.sin(math.pi - m) * m

    stream_dtype = wt.dtype
    in_itemsize = jnp.dtype(stream_dtype).itemsize
    out_itemsize = jnp.dtype(out_dtype).itemsize

    # Hoisted out of the class-tile loop: x row inverse norms (one pass over x),
    # with s folded in so the kernel does a single rank-1 rescale.
    x32 = x.astype(jnp.float32)
    inv_xn = jax.lax.rsqrt(
        jnp.maximum(jnp.sum(x32 * x32, axis=1, keepdims=True), _EPS_SQ))   # (B, 1)
    s_inv_xn = s * inv_xn
    x_in = x.astype(stream_dtype)

    if label is None:
        label2d = jnp.full((B, 1), -1, dtype=jnp.int32)   # never matches -> s * cosine
        delta = jnp.zeros((B, 1), dtype=jnp.float32)
    else:
        label = label.astype(jnp.int32)
        label2d = label.reshape(B, 1)
        delta = _label_delta(x_in, inv_xn, wt, inv_wn, label,
                             s, cos_m, sin_m, th, mm, easy_margin)

    vmem_limit = _vmem_limit_bytes(B, D, tile_c, in_itemsize, out_itemsize)
    kernel = functools.partial(_arcface_kernel, tile_c=tile_c)

    out = pl.pallas_call(
        kernel,
        out_shape=jax.ShapeDtypeStruct((B, c_pad), out_dtype),
        grid_spec=pltpu.PrefetchScalarGridSpec(
            num_scalar_prefetch=0,
            grid=(c_pad // tile_c,),
            in_specs=[
                pl.BlockSpec((B, D), lambda j: (0, 0)),        # x: resident
                pl.BlockSpec((D, tile_c), lambda j: (0, j)),   # weight tile: streamed
                pl.BlockSpec((1, tile_c), lambda j: (0, j)),   # 1/||w||: streamed
                pl.BlockSpec((B, 1), lambda j: (0, 0)),        # s/||x||
                pl.BlockSpec((B, 1), lambda j: (0, 0)),        # per-row margin delta
                pl.BlockSpec((B, 1), lambda j: (0, 0)),        # labels
            ],
            out_specs=pl.BlockSpec((B, tile_c), lambda j: (0, j)),
        ),
        compiler_params=pltpu.CompilerParams(
            dimension_semantics=("parallel",),
            vmem_limit_bytes=vmem_limit,
        ),
    )(x_in, wt, inv_wn, s_inv_xn, delta, label2d)

    if c_pad != C:
        out = out[:, :C]
    return out


# ----------------------------------------------------------------------------- reference


def _reference(x, weight, label=None, s=30.0, m=0.5, easy_margin=False):
    # Pure-JAX reference mirroring the PyTorch forward.
    cos_m, sin_m = math.cos(m), math.sin(m)
    th = math.cos(math.pi - m)
    mm = math.sin(math.pi - m) * m
    x_n = x / jnp.maximum(jnp.linalg.norm(x, axis=1, keepdims=True), 1e-12)
    w_n = weight / jnp.maximum(jnp.linalg.norm(weight, axis=1, keepdims=True), 1e-12)
    cosine = x_n @ w_n.T
    sine = jnp.sqrt(jnp.clip(1.0 - cosine ** 2, 0.0, 1.0))
    phi = cosine * cos_m - sine * sin_m
    if easy_margin:
        phi = jnp.where(cosine > 0, phi, cosine)
    else:
        phi = jnp.where(cosine > th, phi, cosine - mm)
    if label is None:
        out = cosine
    else:
        one_hot = jax.nn.one_hot(label, cosine.shape[1], dtype=cosine.dtype)
        out = one_hot * phi + (1.0 - one_hot) * cosine
    return out * s


if __name__ == "__main__":
    B = 8
    IN_FEATURES = 32
    OUT_FEATURES = 200  # non-multiple of 128: exercises the class-padding path

    key = jax.random.PRNGKey(0)
    kx, kw, kl = jax.random.split(key, 3)

    x = jax.random.normal(kx, (B, IN_FEATURES), dtype=jnp.float32)

    # xavier_uniform_ init for weight (out_features, in_features)
    bound = math.sqrt(6.0 / (IN_FEATURES + OUT_FEATURES))
    weight = jax.random.uniform(
        kw, (OUT_FEATURES, IN_FEATURES), dtype=jnp.float32,
        minval=-bound, maxval=bound)

    label = jax.random.randint(kl, (B,), 0, OUT_FEATURES, dtype=jnp.int32)

    ref_l = _reference(x, weight, label, s=30.0, m=0.5, easy_margin=False)
    ref_n = _reference(x, weight, None)

    # --- f32 streaming path: tight-tolerance check against the reference. ---
    params_f32 = prepare_arcface_params(weight, compute_dtype=jnp.float32, batch_hint=B)
    out = jax.block_until_ready(arc_margin_product(x, params_f32, label))
    assert out.shape == (B, OUT_FEATURES)
    assert jnp.allclose(out, ref_l, atol=1e-4, rtol=1e-4), \
        f"f32 labeled max err {jnp.max(jnp.abs(out - ref_l))}"
    out_n = jax.block_until_ready(arc_margin_product(x, params_f32, None))
    assert jnp.allclose(out_n, ref_n, atol=1e-4, rtol=1e-4), \
        f"f32 no-label max err {jnp.max(jnp.abs(out_n - ref_n))}"

    # --- default bf16 streaming path (prepare once, reuse across calls). ---
    # bf16 streaming is only accurate to ~1e-2 relative, hence the looser tolerance.
    params_bf16 = prepare_arcface_params(weight, batch_hint=B)
    out_b = jax.block_until_ready(arc_margin_product(x, params_bf16, label))
    assert out_b.shape == (B, OUT_FEATURES)
    assert jnp.allclose(out_b, ref_l, atol=0.5, rtol=0.05), \
        f"bf16 labeled max err {jnp.max(jnp.abs(out_b - ref_l))}"
    out_bn = jax.block_until_ready(arc_margin_product(x, params_bf16, None))
    assert jnp.allclose(out_bn, ref_n, atol=0.5, rtol=0.05), \
        f"bf16 no-label max err {jnp.max(jnp.abs(out_bn - ref_n))}"

    print("KERNEL_OK")
</pallas_src>

<mosaic_0001>
module attributes {stable_mosaic.version = 11 : i64} {
  func.func @_arcface_kernel(%arg0: i32, %arg1: memref<8x32xf32, #tpu.memory_space<vmem>>, %arg2: memref<32x128xf32, #tpu.memory_space<vmem>>, %arg3: memref<1x128xf32, #tpu.memory_space<vmem>>, %arg4: memref<8x1xf32, #tpu.memory_space<vmem>>, %arg5: memref<8x1xf32, #tpu.memory_space<vmem>>, %arg6: memref<8x1xi32, #tpu.memory_space<vmem>>, %arg7: memref<8x128xf32, #tpu.memory_space<vmem>>) attributes {dimension_semantics = [#tpu.dimension_semantics<parallel>], iteration_bounds = array<i64: 2>, scalar_prefetch = 0 : i64, scratch_operands = 0 : i64, tpu.core_type = #tpu.core_type<tc>, window_params = [{pipeline_mode = #tpu.pipeline_mode<synchronous>, transform_indices = @transform_0, window_bounds = array<i64: 8, 32>}, {transform_indices = @transform_1, window_bounds = array<i64: 32, 128>}, {transform_indices = @transform_2, window_bounds = array<i64: 1, 128>}, {pipeline_mode = #tpu.pipeline_mode<synchronous>, transform_indices = @transform_3, window_bounds = array<i64: 8, 1>}, {pipeline_mode = #tpu.pipeline_mode<synchronous>, transform_indices = @transform_4, window_bounds = array<i64: 8, 1>}, {pipeline_mode = #tpu.pipeline_mode<synchronous>, transform_indices = @transform_5, window_bounds = array<i64: 8, 1>}, {transform_indices = @transform_6, window_bounds = array<i64: 8, 128>}]} {
    %c0 = arith.constant 0 : index
    %c0_0 = arith.constant 0 : index
    %0 = vector.load %arg1[%c0, %c0_0] : memref<8x32xf32, #tpu.memory_space<vmem>>, vector<8x32xf32>
    %c0_1 = arith.constant 0 : index
    %c0_2 = arith.constant 0 : index
    %1 = vector.load %arg2[%c0_1, %c0_2] : memref<32x128xf32, #tpu.memory_space<vmem>>, vector<32x128xf32>
    %cst = arith.constant dense<0.000000e+00> : vector<8x128xf32>
    %2 = tpu.matmul %0, %1, %cst {dimension_numbers = #tpu.dot_dimension_numbers<[1], [0], [0], [1], [0, 0, 1, 1], [], []>} : vector<8x32xf32>, vector<32x128xf32>, vector<8x128xf32> -> vector<8x128xf32>
    %c0_3 = arith.constant 0 : index
    %c0_4 = arith.constant 0 : index
    %3 = vector.load %arg4[%c0_3, %c0_4] : memref<8x1xf32, #tpu.memory_space<vmem>>, vector<8x1xf32>
    %4 = vector.broadcast %3 : vector<8x1xf32> to vector<8x128xf32>
    %5 = arith.mulf %2, %4 : vector<8x128xf32>
    %c0_5 = arith.constant 0 : index
    %c0_6 = arith.constant 0 : index
    %6 = vector.load %arg3[%c0_5, %c0_6] : memref<1x128xf32, #tpu.memory_space<vmem>>, vector<1x128xf32>
    %7 = vector.broadcast %6 : vector<1x128xf32> to vector<8x128xf32>
    %8 = arith.mulf %5, %7 : vector<8x128xf32>
    %c0_7 = arith.constant 0 : index
    %c0_8 = arith.constant 0 : index
    %9 = vector.load %arg6[%c0_7, %c0_8] : memref<8x1xi32, #tpu.memory_space<vmem>>, vector<8x1xi32>
    %c128_i32 = arith.constant 128 : i32
    %10 = arith.muli %arg0, %c128_i32 : i32
    %11 = vector.broadcast %10 : i32 to vector<8x1xi32>
    %12 = arith.subi %9, %11 : vector<8x1xi32>
    %13 = tpu.iota {dimensions = array<i32: 1>} : vector<1x128xi32>
    %14 = vector.broadcast %13 : vector<1x128xi32> to vector<8x128xi32>
    %15 = vector.broadcast %12 : vector<8x1xi32> to vector<8x128xi32>
    %16 = arith.cmpi eq, %14, %15 : vector<8x128xi32>
    %c0_9 = arith.constant 0 : index
    %c0_10 = arith.constant 0 : index
    %17 = vector.load %arg5[%c0_9, %c0_10] : memref<8x1xf32, #tpu.memory_space<vmem>>, vector<8x1xf32>
    %cst_11 = arith.constant 0.000000e+00 : f32
    %18 = vector.shape_cast %17 : vector<8x1xf32> to vector<8x1xf32>
    %19 = vector.broadcast %18 : vector<8x1xf32> to vector<8x128xf32>
    %20 = vector.broadcast %cst_11 : f32 to vector<8x128xf32>
    %21 = arith.select %16, %19, %20 : vector<8x128xi1>, vector<8x128xf32>
    %22 = arith.addf %8, %21 : vector<8x128xf32>
    %c0_12 = arith.constant 0 : index
    %c0_13 = arith.constant 0 : index
    %23 = vector.load %arg7[%c0_12, %c0_13] : memref<8x128xf32, #tpu.memory_space<vmem>>, vector<8x128xf32>
    tpu.vector_store %arg7[%c0_12, %c0_13], %22 {strides = array<i32>} : memref<8x128xf32, #tpu.memory_space<vmem>>, vector<8x128xf32>,
    return
  }
  func.func @transform_0(%arg0: i32) -> (i32, i32) {
    %c0_i32 = arith.constant 0 : i32
    %c0_i32_0 = arith.constant 0 : i32
    %c0_i32_1 = arith.constant 0 : i32
    return %c0_i32, %c0_i32_0 : i32, i32
  }
  func.func @transform_1(%arg0: i32) -> (i32, i32) {
    %c0_i32 = arith.constant 0 : i32
    %c0_i32_0 = arith.constant 0 : i32
    return %c0_i32, %arg0 : i32, i32
  }
  func.func @transform_2(%arg0: i32) -> (i32, i32) {
    %c0_i32 = arith.constant 0 : i32
    %c0_i32_0 = arith.constant 0 : i32
    return %c0_i32, %arg0 : i32, i32
  }
  func.func @transform_3(%arg0: i32) -> (i32, i32) {
    %c0_i32 = arith.constant 0 : i32
    %c0_i32_0 = arith.constant 0 : i32
    %c0_i32_1 = arith.constant 0 : i32
    return %c0_i32, %c0_i32_0 : i32, i32
  }
  func.func @transform_4(%arg0: i32) -> (i32, i32) {
    %c0_i32 = arith.constant 0 : i32
    %c0_i32_0 = arith.constant 0 : i32
    %c0_i32_1 = arith.constant 0 : i32
    return %c0_i32, %c0_i32_0 : i32, i32
  }
  func.func @transform_5(%arg0: i32) -> (i32, i32) {
    %c0_i32 = arith.constant 0 : i32
    %c0_i32_0 = arith.constant 0 : i32
    %c0_i32_1 = arith.constant 0 : i32
    return %c0_i32, %c0_i32_0 : i32, i32
  }
  func.func @transform_6(%arg0: i32) -> (i32, i32) {
    %c0_i32 = arith.constant 0 : i32
    %c0_i32_0 = arith.constant 0 : i32
    return %c0_i32, %arg0 : i32, i32
  }
}

</mosaic_0001>

<bundles_post_ra>
// kernel: tpu_custom_call.1
= control target key start
LH: loop header
LB: loop body
LE: loop exit
PB: predicated region body
PF: predicated region fallthrough
CT: control target
= control target key end

     0   :  { %11 = vsyncpa [#allocation3], 0  ;;  %s875_s0 = inlined_call_operand.vmem [shape: f32[8,32], index: 0, kind: input, shape index: {}]   ;;  %s876_s1 = inlined_call_operand.hbm [shape: f32[32,256], index: 1, kind: input, shape index: {}]   ;;  %s877_s2 = inlined_call_operand.vmem [shape: f32[1,256], index: 2, kind: input, shape index: {}]   ;;  %s878_s3 = inlined_call_operand.vmem [shape: f32[8,1], index: 3, kind: input, shape index: {}]   ;;  %s879_s4 = inlined_call_operand.vmem [shape: f32[8,1], index: 4, kind: input, shape index: {}]   ;;  %s880_s5 = inlined_call_operand.vmem [shape: s32[8,1], index: 5, kind: input, shape index: {}]   ;;  %s881_s6 = inlined_call_operand.hbm [shape: f32[8,256], index: 6, kind: output, shape index: {}]  }
   0x1   :  { %13 = vsyncpa [#allocation3 + $0x1], 0 }
   0x2   :  { %14 = vsyncpa [#allocation4], 0 }
   0x3   :  { %16 = vsyncpa [#allocation4 + $0x1], 0  ;;  %s711_s21 = smov 0   ;;  %s713_s22 = smov 0  }
   0x4   :  { %s715_s23 = smov 0   ;;  %s717_s24 = smov 0  }
   0x5 LB: > { %s732_s25 = sadd.s32 4294967295, %s666_s24   ;;  %s489_s26 = sadd.s32 4294967294, %s666_s24   ;;  %s666_s24 = sphi %s717_s24, %s897_s24   ;;  %s662_s23 = sphi %s715_s23, %s896_s23   ;;  %s658_s22 = sphi %s713_s22, %s895_s22   ;;  %s654_s21 = sphi %s711_s21, %s894_s21  }
   0x6   : > { %s736_s27 = sadd.s32 1, %s666_s24   ;;  %s50_s28 = sadd.s32 1, %s662_s23 }
   0x7   : > { %s47_s29 = ssub.s32 %s666_s24, %s736_s27  ;;  %p57_p0 = scmp.ne.s32.totalorder %s662_s23, %s658_s22 }
   0x8   : > { %p48_p1 = scmp.eq.s32.totalorder %s47_s29, 0  ;;  %p58_p2 = scmp.eq.s32.totalorder %s666_s24, 0 }
   0x9   : > { %p63_p3 = scmp.ne.s32.totalorder %s658_s22, %s654_s21  ;;  %p64_p4 = scmp.eq.s32.totalorder %s732_s25, 0 }
   0xa   : > { %s748_s30 = scalar_select %p48_p1, %s662_s23, %s50_s28  }
   0xb   : > { %p750_p5 = por %p58_p2, %p57_p0  ;;  %p754_p6 = por %p64_p4, %p63_p3 }
   0xc   : > { %p176_p7 = scmp.eq.s32.totalorder %s732_s25, 1  ;;  %p182_p8 = scmp.eq.s32.totalorder %s489_s26, 1 }
   0xd   : > { %s885_s8 = scalar_select %p754_p6, 1, 0 }
   0xe   : > { %p532_p10 = scmp.lt.s32.totalorder %s666_s24, 2  ;;  %p761_p11 = por %p176_p7, %p57_p0 }
   0xf   : > { %p765_p12 = por %p182_p8, %p63_p3  ;;  %s214_s11 = sand.u32 1, %s662_s23  }
  0x10   : > { %s886_s9 = scalar_select %p761_p11, 1, 0 }
  0x11   : > { %s887_s10 = scalar_select %p765_p12, 1, 0 }
  0x12   : > { %s493_s12 = sshll.u32 %s666_s24, 7  ;;  %s492_s13 = sshll.u32 %s214_s11, 5 }
  0x13   : > { %s774_s16 = scalar_lea.hbm %s876_s1, %s493_s12  ;;  %s218_s17 = scalar_lea.vmem [#allocation2], %s492_s13 }
  0x14   : > { %s224_s18 = sshll.u32 %s218_s17, 4  ;;  %p778_p13 = pnand %p532_p10, %p750_p5  ;;  %s782_s18 = int_to_ptr.vmem [resolvable:$true] %s224_s18 }
  0x15   : > { %s785_s20 = scalar_lea.sflag [#allocation3], %s214_s11  ;;  %s574_s26 = scalar_lea.hbm %s774_s16, 512 }
  0x16   : > { %p575_p1 = scmp.ne.s32.totalorder %s774_s16, %s574_s26  ;;  %p576_p2 = pneg %p778_p13 }
  0x17   : > { %s579_s7 = scalar_lea.hbm %s876_s1, 1024  ;;  %p580_p5 = scmp.lt.s32.totalorder %s774_s16, %s876_s1 }
  0x18   : > { %p577_p3 = pnand %p576_p2, %p575_p1  ;;  %p581_p7 = scmp.lt.s32.totalorder %s579_s7, %s574_s26 }
  0x1a   : > { %p578_p4 = pneg %p577_p3  ;;  %p582_p8 = por %p581_p7, %p580_p5 }
  0x1c   : > { %p583_p10 = pnand %p582_p8, %p578_p4 }
  0x1e   : > { %586 = shalt.err (!%p583_p10)
}
  0x1f   : > { %s587_s11 = scalar_lea.vmem %s782_s18, 512  ;;  %s668_s14 = smov [#allocation2]  }
  0x20   : > { %p588_p9 = scmp.ne.s32.totalorder %s782_s18, %s587_s11  ;;  %s592_s15 = sshll.u32 %s668_s14, 4  ;;  %s593_s15 = int_to_ptr.vmem [resolvable:$false] %s592_s15 }
  0x21   : > { %s594_s17 = scalar_lea.vmem %s593_s15, 1024  ;;  %p595_p3 = scmp.lt.s32.totalorder %s782_s18, %s593_s15 }
  0x22   : > { %p590_p0 = pnand %p588_p9, %p576_p2  ;;  %p596_p12 = scmp.lt.s32.totalorder %s594_s17, %s587_s11 }
  0x24   : > { %p591_p1 = pneg %p590_p0  ;;  %p597_p11 = por %p596_p12, %p595_p3 }
  0x26   : > { %p598_p6 = pnand %p597_p11, %p591_p1 }
  0x28   : > { %601 = shalt.err (!%p598_p6)
}
  0x29   : > { %s669_s26 = smov 256   ;;  %s670_s28 = smov 128  }
  0x2a   : > { %s671_s29 = smov 8   ;;  %p238_p9 = scmp.lt.s32.totalorder %s666_s24, 3 }
  0x2b   : > { %527 = dma.hbm_to_vmem [thread:$0]  (!%p778_p13), %s774_s16, 512, %s782_s18, %s785_s20, %s669_s26, %s670_s28, %s671_s29  }
  0x2c   : > { %p889_p0 = scmp.ge.s32.totalorder %s666_s24, 1 }
  0x2e   : > { %p239_p2 = pnand %p889_p0, %p238_p9 }
  0x2f   : > { %s810_s7 = sand.u32 (!%p239_p2), 1, %s658_s22   ;;  %p890_p6 = scmp.ne.s32.totalorder (!%p239_p2), %s885_s8, 0 }
  0x30   : > { %242 = sbr.rel (%p239_p2) target bundleno = 276 (0x114), region = 44  ;;  %s495_s12 = sshll.u32 (!%p239_p2), %s810_s7, 5 }
  0x31   : > { %s245_s13 = scalar_lea.sflag (!%p239_p2), [#allocation3], %s810_s7  ;;  %s248_s11 = scalar_lea.vmem (!%p239_p2), [#allocation2], %s495_s12 }
  0x35   : > { %645 = dma.done.wait (%p890_p6), %s245_s13, 512  }
  0x36   : > { %647 = vsyncadd (%p890_p6), %s245_s13, 4294966784  ;;  %v672_v0 = vmov 0.0   ;;  %vm673_vm0 = vmmov 0   ;;  %v674_v1 = vmov 0   ;;  %s499_s16 = sshll.u32 %s732_s25, 7  ;;  %v287_v2 = vld [vmem:[%s248_s11 + $0x18] sm:$0xff]  ;;  %v381_v13 = vlaneseq }
  0x37   : > { %509 = vmatprep.subr.mxu0 %v672_v0  ;;  %517 = vmatprep.mubr.msk.f32.mxu0 %vm673_vm0, %v672_v0  ;;  %v286_v3 = vld [vmem:[%s248_s11 + $0x10] sm:$0xff]  ;;  %v379_v4 = vstv %s499_s16  ;;  %v362_v5 = vld [vmem:[%s878_s3] sm:$0xff]  ;;  %v285_v6 = vld [vmem:[%s248_s11 + $0x8] sm:$0xff]  ;;  %vm288_vm1 = vcmask 261120   ;;  %p280_p11 = scmp.lt.s32.totalorder %s732_s25, 1  ;;  %s496_s29 = sshll.u32 %s810_s7, 3 }
  0x38   : > { %572 = vset.pattern.permute.xlu0 %v674_v1  ;;  %573 = vset.pattern.permute.xlu1 %v674_v1  ;;  %v377_v7 = vld [vmem:[%s880_s5] sm:$0xff]  ;;  %v382_v14 = vand.u32 127, %v381_v13  ;;  %s279_s18 = scalar_lea.vmem [#allocation5], %s496_s29  ;;  %s408_s14 = scalar_lea.hbm %s881_s6, %s499_s16 }
  0x39   : > { %510 = vmatpush3.msra.mxu0 %v287_v2  ;;  %365 = vperm.xlu0 %572, %v362_v5   ;;  %v387_v8 = vld [vmem:[%s879_s4] sm:$0xff]  ;;  %v380_v9 = vsub.s32 %v377_v7, %v379_v4  ;;  %s281_s28 = scalar_select %p280_p11, %s732_s25, 1 }
  0x3a   : > { %511 = vmatprep.subr.mxu0 %v672_v0  ;;  %390 = vperm.xlu1 %573, %v387_v8   ;;  %v284_v10 = vld [vmem:[%s248_s11] sm:$0xff]  ;;  %s410_s19 = sshll.u32 %s279_s18, 4  ;;  %s397_s15 = scalar_lea.sflag [#allocation4], %s810_s7  ;;  %s411_s19 = int_to_ptr.vmem [resolvable:$true] %s410_s19 }
  0x3b   : > { %512 = vmatpush3.msra.mxu0 %v286_v3  ;;  %v283_v11 = vld [vmem:[%s875_s0] sm:$0xff]  ;;  %s282_s11 = scalar_lea.vmem %s877_s2, %s281_s28  ;;  %s602_s17 = scalar_lea.vmem %s411_s19, 128 }
  0x3c   : > { %513 = vmatprep.subr.mxu0 %v672_v0  ;;  %v498_v17 = vld [vmem:[%s282_s11] ss:$0 sm:$0xff]  ;;  %p603_p12 = scmp.ne.s32.totalorder %s411_s19, %s602_s17  ;;  %p891_p13 = scmp.ne.s32.totalorder %s886_s9, 0 }
  0x3d   : > { %514 = vmatpush3.msra.mxu0 %v285_v6  ;;  %384 = vperm.xlu0 %572, %v380_v9   ;;  %s675_s26 = smov [#allocation5]  }
  0x3e   : > { %515 = vmatprep.subr.mxu0 %v672_v0  ;;  %p604_p4 = pnand %p603_p12, %p891_p13  ;;  %s606_s28 = sshll.u32 %s675_s26, 4  ;;  %s607_s28 = int_to_ptr.vmem [resolvable:$false] %s606_s28 }
  0x3f   : > { %516 = vmatpush3.msra.mxu0 %v284_v10  ;;  %s608_s29 = scalar_lea.vmem %s607_s28, 256  ;;  %p609_p7 = scmp.lt.s32.totalorder %s411_s19, %s607_s28 }
  0x40   : > { %518 = vmatmul.mubr.msk.f32.vlgmr.msra.gmra.mxu0 %vm288_vm1, %v283_v11  ;;  %p605_p5 = pneg %p604_p4  ;;  %p610_p8 = scmp.lt.s32.totalorder %s608_s29, %s602_s17 }
  0x42   : > { %p611_p10 = por %p610_p8, %p609_p7 }
  0x44   : > { %p612_p1 = pnand %p611_p10, %p605_p5 }
  0xb4   : > { %v366_v12 = vpop.permute.xlu0 %365 }
  0xb5   : > { %v391_v18 = vpop.permute.xlu1 %390 }
  0xb8   : > { %v385_v15 = vpop.permute.xlu0 %384 }
  0xb9   : > { %vm386_vm2 = vcmp.eq.s32.totalorder %v382_v14, %v385_v15 }
  0xba   : > { %v393_v22 = vsel %vm386_vm2, %v391_v18, 0.0 }
 0x100   : > { %v358_v16 = vpop.f32.mrf.mxu0 }
 0x101   : > { %v368_v19 = vmul.f32 %v366_v12, %v358_v16 }
 0x102   : > { %v519_v20 = vpop.f32.mrf.mxu0 }
 0x103   : > { %v376_v21 = vmul.f32 %v498_v17, %v368_v19 }
 0x105   : > { %v394_v23 = vadd.f32 %v393_v22, %v376_v21 }
 0x107   : > { %395 = vst [vmem:[%s279_s18] sm:$0xff] %v394_v23 }
 0x108   : > { %615 = shalt.err (!%p612_p1)
}
 0x109   : > { %s616_s25 = scalar_lea.hbm %s408_s14, 128  ;;  %s620_s12 = scalar_lea.hbm %s881_s6, 256 }
 0x10a   : > { %p617_p3 = scmp.ne.s32.totalorder %s408_s14, %s616_s25  ;;  %p621_p2 = scmp.lt.s32.totalorder %s408_s14, %s881_s6 }
 0x10b   : > { %p622_p6 = scmp.lt.s32.totalorder %s620_s12, %s616_s25 }
 0x10c   : > { %p618_p9 = pnand %p617_p3, %p891_p13 }
 0x10d   : > { %p623_p11 = por %p622_p6, %p621_p2 }
 0x10e   : > { %p619_p0 = pneg %p618_p9 }
 0x110   : > { %p624_p12 = pnand %p623_p11, %p619_p0 }
 0x112   : > { %627 = shalt.err (!%p624_p12)
}
 0x113   : > { %522 = dma.vmem_to_hbm [thread:$0]  (%p891_p13), %s411_s19, 128, %s408_s14, %s397_s15  }
 0x114 PF: > { %s422_s18 = sand.u32 1, %s654_s21   ;;  %p892_p4 = scmp.ne.s32.totalorder %s887_s10, 0 }
 0x115   : > { %p893_p5 = scmp.ge.s32.totalorder %s666_s24, 2  ;;  %s423_s8 = scalar_lea.sflag [#allocation4], %s422_s18 }
 0x117   : > { %p529_p7 = pnand %p893_p5, %p892_p4 }
 0x119   : > { %p530_p8 = pneg %p529_p7 }
 0x11b   : > { %649 = dma.done.wait (%p530_p8), %s423_s8, 128  }
 0x11c   : > { %651 = vsyncadd (%p530_p8), %s423_s8, 4294967168  ;;  %p19_p10 = scmp.ge.s32.totalorder %s736_s27, 4   ;;  %s894_s21 = smov %s658_s22 }
 0x11d   : > { %s895_s22 = smov %s662_s23  ;;  %s896_s23 = smov %s748_s30 }
 0x11e   : > { %s897_s24 = smov %s736_s27  ;;  %21 = sbr.rel (!%p19_p10) target bundleno = 5 (0x5), region = 92 }
 0x123   :  { %428 = vsyncpa [#allocation3], 1 }
 0x124   :  { %430 = vsyncpa [#allocation3 + $0x1], 1 }
 0x125   :  { %431 = vsyncpa [#allocation4], 1 }
 0x126   :  { %433 = vsyncpa [#allocation4 + $0x1], 1 }

</bundles_post_ra>
